<compile_context>
chip_gen: v7x
topology: tpu7x:2x2x1
jax: 0.10.0
libtpu: 0.0.40
codegen_flags: <defaults>
</compile_context>

<pallas_src>
import jax
import jax.numpy as jnp
from jax.experimental import pallas as pl
from jax.experimental.pallas import tpu as pltpu

NUM_FRAMES = 5
NUM_ACTIONS = 4
CNN_FEAT = 32 * 10 * 10        # 3200
HID = 64                       # cnn_fc_layer width
FC_HID = 64                    # classifier hidden width (fc_dims=(64,))
CLS_IN = HID * NUM_FRAMES      # 320
OUT_PAD = 128                  # lane-dense padded output width (sliced to 4 in wrapper)


# ---------------------------- fused Pallas kernel ----------------------------

def nav_cnn_fused_kernel(x_ref, wcnn_ref, b12_ref, wfc1_ref, wfc2_ref, b2_ref,
                         o_ref, acc_ref):
    # Grid step (i, t): row block i, frame t (frame axis = reduction, iterated innermost).
    # x_ref:    (TM, 3200)   f32   frame-t slice of row block i
    # wcnn_ref: (3200, 64)   bf16  cnn_fc_layer weight (resident across grid steps)
    # b12_ref:  (2, 64)      f32   row 0 = b_cnn, row 1 = b_fc1
    # wfc1_ref: (1, 64, 64)  bf16  frame-t slice of classifier Linear(320,64) weight
    # wfc2_ref: (64, 128)    f32   classifier Linear(64,4) weight, zero-padded to 128 lanes
    # b2_ref:   (1, 128)     f32   zero-padded b_fc2
    # o_ref:    (TM, 128)    f32   padded scores (cols 0:4 valid), resident across frame axis
    # acc_ref:  (TM, 64)     f32   VMEM scratch accumulator for flat @ w_fc1
    t = pl.program_id(1)

    @pl.when(t == 0)
    def _init():
        acc_ref[...] = jnp.zeros_like(acc_ref)

    b_cnn = b12_ref[0:1, :]                                  # (1, 64)
    x_t = x_ref[...].astype(jnp.bfloat16)                    # bf16 MXU operand (see contract)
    h_t = jnp.dot(x_t, wcnn_ref[...], preferred_element_type=jnp.float32)
    h_t = jnp.maximum(h_t + b_cnn, 0.0)                      # cnn_fc_layer ReLU (Dropout = id)
    # flat @ w_fc1 == sum_t h_t @ w_fc1[t]  (no in-kernel reshape / cross-lane shuffle)
    acc_ref[...] += jnp.dot(h_t.astype(jnp.bfloat16), wfc1_ref[0],
                            preferred_element_type=jnp.float32)

    @pl.when(t == pl.num_programs(1) - 1)
    def _epilogue():
        b_fc1 = b12_ref[1:2, :]                              # (1, 64)
        h2 = jnp.maximum(acc_ref[...] + b_fc1, 0.0)          # classifier hidden ReLU
        o_ref[...] = (jnp.dot(h2, wfc2_ref[...], preferred_element_type=jnp.float32)
                      + b2_ref[...])                         # lane-dense unmasked store


# ------------------------ one-time weight preparation ------------------------

def prepare_params(params):
    """Hoisted out of the forward: run once at parameter-load time (or jit-cache)."""
    return dict(
        wcnn_bf16=params["w_cnn"].astype(jnp.bfloat16),                           # 800->400 KiB
        b12=jnp.concatenate([params["b_cnn"], params["b_fc1"]], axis=0),          # (2, 64)
        wfc1_bf16=params["w_fc1"].reshape(NUM_FRAMES, HID, FC_HID)
                                 .astype(jnp.bfloat16),                           # (5, 64, 64)
        wfc2_pad=jnp.zeros((FC_HID, OUT_PAD), jnp.float32)
                    .at[:, :NUM_ACTIONS].set(params["w_fc2"]),
        b2_pad=jnp.zeros((1, OUT_PAD), jnp.float32)
                  .at[:, :NUM_ACTIONS].set(params["b_fc2"]),
    )


# --------------------------------- wrapper -----------------------------------

def _round_up(x, m):
    return ((x + m - 1) // m) * m


def _pick_tm(n, block_rows):
    """Row-tile size.  Full batch for tiny N; otherwise >= 2 row blocks (keeps both v7x
    TensorCores busy), rounded to a sublane multiple of 8, capped at block_rows."""
    if n < 32:
        return n                                        # single full-extent block
    if n <= block_rows:
        return min(block_rows, _round_up(pl.cdiv(n, 2), 8))
    return block_rows


def nav_cnn_forward(img_feats, prepped, *, block_rows=256):
    """img_feats: (N, T, 3200) float32.  prepped = prepare_params(params).
    Returns (N, 4) float32 action scores."""
    N, T, F = img_feats.shape
    assert T == NUM_FRAMES and F == CNN_FEAT

    x2d = img_feats.reshape(N, T * F)                   # contiguous view, no data movement
    tm = _pick_tm(N, block_rows)
    grid = (pl.cdiv(N, tm), NUM_FRAMES)                 # (row blocks, frames[reduction])

    flops = 2 * N * (T * F * HID + T * HID * FC_HID + FC_HID * OUT_PAD)
    bytes_accessed = (N * T * F * 4                         # x (f32 in HBM)
                      + F * HID * 2                         # w_cnn (bf16)
                      + NUM_FRAMES * HID * FC_HID * 2       # w_fc1 (bf16)
                      + (2 * HID + FC_HID * OUT_PAD + OUT_PAD) * 4
                      + N * OUT_PAD * 4)                    # padded output

    out_padded = pl.pallas_call(
        nav_cnn_fused_kernel,
        out_shape=jax.ShapeDtypeStruct((N, OUT_PAD), jnp.float32),
        grid=grid,
        in_specs=[
            pl.BlockSpec((tm, CNN_FEAT), lambda i, t: (i, t)),        # per-frame row tile of x
            pl.BlockSpec((CNN_FEAT, HID), lambda i, t: (0, 0)),       # weights stay resident
            pl.BlockSpec((2, HID), lambda i, t: (0, 0)),
            pl.BlockSpec((1, HID, FC_HID), lambda i, t: (t, 0, 0)),   # frame-t slice of w_fc1
            pl.BlockSpec((FC_HID, OUT_PAD), lambda i, t: (0, 0)),
            pl.BlockSpec((1, OUT_PAD), lambda i, t: (0, 0)),
        ],
        out_specs=pl.BlockSpec((tm, OUT_PAD), lambda i, t: (i, 0)),   # resident across frames
        scratch_shapes=[pltpu.VMEM((tm, FC_HID), jnp.float32)],       # fc1 accumulator
        compiler_params=pltpu.CompilerParams(
            dimension_semantics=("parallel", "arbitrary")),
        cost_estimate=pl.CostEstimate(flops=flops, transcendentals=0,
                                      bytes_accessed=bytes_accessed),
    )(x2d, prepped["wcnn_bf16"], prepped["b12"], prepped["wfc1_bf16"],
      prepped["wfc2_pad"], prepped["b2_pad"])

    return out_padded[:, :NUM_ACTIONS]

# TODO(synk): nn.Dropout(p=0.5) layers are identity (eval-mode forward); question_input=True
# branch (QuestionLstmEncoder + ques_tr) is not exercised by the default config.


# ----------------------- deterministic params & reference --------------------

def init_params(key):
    ks = jax.random.split(key, 6)

    def lin(kw, kb, fan_in, fan_out):
        bound = 1.0 / jnp.sqrt(fan_in)
        w = jax.random.uniform(kw, (fan_in, fan_out), jnp.float32, -bound, bound)
        b = jax.random.uniform(kb, (1, fan_out), jnp.float32, -bound, bound)
        return w, b

    w_cnn, b_cnn = lin(ks[0], ks[1], CNN_FEAT, HID)         # cnn_fc_layer Linear(3200, 64)
    w_fc1, b_fc1 = lin(ks[2], ks[3], CLS_IN, FC_HID)        # classifier Linear(320, 64)
    w_fc2, b_fc2 = lin(ks[4], ks[5], FC_HID, NUM_ACTIONS)   # classifier Linear(64, 4)
    return dict(w_cnn=w_cnn, b_cnn=b_cnn,
                w_fc1=w_fc1, b_fc1=b_fc1,
                w_fc2=w_fc2, b_fc2=b_fc2)


def reference_forward(img_feats, p, *, match_kernel_precision):
    """Pure-JAX reference.  match_kernel_precision=True mimics the kernel's precision contract
    (bf16 operands into the first two matmuls, f32 accumulation/bias/ReLU)."""
    N, T, F = img_feats.shape
    x = img_feats.reshape(N * T, F)
    w_cnn, w_fc1 = p["w_cnn"], p["w_fc1"]
    if match_kernel_precision:
        x = x.astype(jnp.bfloat16)
        w_cnn = w_cnn.astype(jnp.bfloat16)
        w_fc1 = w_fc1.astype(jnp.bfloat16)
    h = jnp.maximum(jnp.dot(x, w_cnn, preferred_element_type=jnp.float32) + p["b_cnn"], 0.0)
    if match_kernel_precision:
        h = h.astype(jnp.bfloat16)
    flat = h.reshape(N, T * HID)
    h2 = jnp.maximum(jnp.dot(flat, w_fc1, preferred_element_type=jnp.float32) + p["b_fc1"], 0.0)
    return jnp.dot(h2, p["w_fc2"], preferred_element_type=jnp.float32) + p["b_fc2"]


if __name__ == "__main__":
    key = jax.random.PRNGKey(0)
    k_params, k_x1, k_x2 = jax.random.split(key, 3)

    params = init_params(k_params)
    prepped = prepare_params(params)        # one-time weight prep, outside the forward

    # N=2 episodes, T=5 frames, 3200-dim flattened CNN features per frame.
    img_feats = jax.random.normal(k_x1, (2, NUM_FRAMES, CNN_FEAT), jnp.float32)
    scores = jax.block_until_ready(nav_cnn_forward(img_feats, prepped))
    assert scores.shape == (2, NUM_ACTIONS)

    # Tight check against a reference using the same bf16 matmul precision.
    ref_bf16 = reference_forward(img_feats, params, match_kernel_precision=True)
    assert jnp.allclose(scores, ref_bf16, atol=2e-3, rtol=2e-3)
    # Loose check against the full-f32 PyTorch-equivalent forward.
    ref_f32 = reference_forward(img_feats, params, match_kernel_precision=False)
    assert jnp.allclose(scores, ref_f32, atol=3e-2, rtol=3e-2)

    # Exercise the multi-row-block + ragged-last-block path of the frame-reduction grid.
    img_feats_big = jax.random.normal(k_x2, (40, NUM_FRAMES, CNN_FEAT), jnp.float32)
    scores_big = jax.block_until_ready(nav_cnn_forward(img_feats_big, prepped))
    ref_big = reference_forward(img_feats_big, params, match_kernel_precision=True)
    assert scores_big.shape == (40, NUM_ACTIONS)
    assert jnp.allclose(scores_big, ref_big, atol=2e-3, rtol=2e-3)

    print("KERNEL_OK")
</pallas_src>

<mosaic_0001>
module attributes {stable_mosaic.version = 11 : i64} {
  func.func @nav_cnn_fused_kernel(%arg0: i32, %arg1: i32, %arg2: memref<2x3200xf32, #tpu.memory_space<vmem>>, %arg3: memref<3200x64xbf16, #tpu.memory_space<vmem>>, %arg4: memref<2x64xf32, #tpu.memory_space<vmem>>, %arg5: memref<1x64x64xbf16, #tpu.memory_space<vmem>>, %arg6: memref<64x128xf32, #tpu.memory_space<vmem>>, %arg7: memref<1x128xf32, #tpu.memory_space<vmem>>, %arg8: memref<2x128xf32, #tpu.memory_space<vmem>>, %arg9: memref<2x64xf32, #tpu.memory_space<vmem>>) attributes {dimension_semantics = [#tpu.dimension_semantics<parallel>, #tpu.dimension_semantics<arbitrary>], iteration_bounds = array<i64: 1, 5>, scalar_prefetch = 0 : i64, scratch_operands = 1 : i64, tpu.core_type = #tpu.core_type<tc>, window_params = [{transform_indices = @transform_0, window_bounds = array<i64: 2, 3200>}, {pipeline_mode = #tpu.pipeline_mode<synchronous>, transform_indices = @transform_1, window_bounds = array<i64: 3200, 64>}, {pipeline_mode = #tpu.pipeline_mode<synchronous>, transform_indices = @transform_2, window_bounds = array<i64: 2, 64>}, {transform_indices = @transform_3, window_bounds = array<i64: 1, 64, 64>}, {pipeline_mode = #tpu.pipeline_mode<synchronous>, transform_indices = @transform_4, window_bounds = array<i64: 64, 128>}, {pipeline_mode = #tpu.pipeline_mode<synchronous>, transform_indices = @transform_5, window_bounds = array<i64: 1, 128>}, {transform_indices = @transform_6, window_bounds = array<i64: 2, 128>}]} {
    %c0_i32 = arith.constant 0 : i32
    %0 = arith.cmpi eq, %arg1, %c0_i32 : i32
    %1 = arith.extui %0 : i1 to i32
    %c0_i32_0 = arith.constant 0 : i32
    %2 = arith.cmpi ne, %1, %c0_i32_0 : i32
    scf.if %2 {
      %cst_16 = arith.constant 0.000000e+00 : f32
      %22 = vector.broadcast %cst_16 : f32 to vector<2x64xf32>
      %c0_17 = arith.constant 0 : index
      %c0_18 = arith.constant 0 : index
      %23 = vector.load %arg9[%c0_17, %c0_18] : memref<2x64xf32, #tpu.memory_space<vmem>>, vector<2x64xf32>
      tpu.vector_store %arg9[%c0_17, %c0_18], %22 {strides = array<i32>} : memref<2x64xf32, #tpu.memory_space<vmem>>, vector<2x64xf32>,
    } else {
    }
    %c0 = arith.constant 0 : index
    %c0_1 = arith.constant 0 : index
    %3 = vector.load %arg4[%c0, %c0_1] : memref<2x64xf32, #tpu.memory_space<vmem>>, vector<1x64xf32>
    %c0_2 = arith.constant 0 : index
    %c0_3 = arith.constant 0 : index
    %4 = vector.load %arg2[%c0_2, %c0_3] : memref<2x3200xf32, #tpu.memory_space<vmem>>, vector<2x3200xf32>
    %5 = arith.truncf %4 : vector<2x3200xf32> to vector<2x3200xbf16>
    %c0_4 = arith.constant 0 : index
    %c0_5 = arith.constant 0 : index
    %6 = vector.load %arg3[%c0_4, %c0_5] : memref<3200x64xbf16, #tpu.memory_space<vmem>>, vector<3200x64xbf16>
    %cst = arith.constant dense<0.000000e+00> : vector<2x64xf32>
    %7 = tpu.matmul %5, %6, %cst {dimension_numbers = #tpu.dot_dimension_numbers<[1], [0], [0], [1], [0, 0, 1, 1], [], []>} : vector<2x3200xbf16>, vector<3200x64xbf16>, vector<2x64xf32> -> vector<2x64xf32>
    %8 = vector.broadcast %3 : vector<1x64xf32> to vector<2x64xf32>
    %9 = arith.addf %7, %8 : vector<2x64xf32>
    %cst_6 = arith.constant 0.000000e+00 : f32
    %10 = vector.broadcast %cst_6 : f32 to vector<2x64xf32>
    %11 = arith.maximumf %9, %10 : vector<2x64xf32>
    %c0_7 = arith.constant 0 : index
    %c0_8 = arith.constant 0 : index
    %12 = vector.load %arg9[%c0_7, %c0_8] : memref<2x64xf32, #tpu.memory_space<vmem>>, vector<2x64xf32>
    %13 = arith.truncf %11 : vector<2x64xf32> to vector<2x64xbf16>
    %c0_9 = arith.constant 0 : index
    %c0_10 = arith.constant 0 : index
    %c0_11 = arith.constant 0 : index
    %14 = vector.load %arg5[%c0_9, %c0_10, %c0_11] : memref<1x64x64xbf16, #tpu.memory_space<vmem>>, vector<1x64x64xbf16>
    %15 = vector.shape_cast %14 : vector<1x64x64xbf16> to vector<64x64xbf16>
    %cst_12 = arith.constant dense<0.000000e+00> : vector<2x64xf32>
    %16 = tpu.matmul %13, %15, %cst_12 {dimension_numbers = #tpu.dot_dimension_numbers<[1], [0], [0], [1], [0, 0, 1, 1], [], []>} : vector<2x64xbf16>, vector<64x64xbf16>, vector<2x64xf32> -> vector<2x64xf32>
    %17 = arith.addf %12, %16 : vector<2x64xf32>
    %c0_13 = arith.constant 0 : index
    %c0_14 = arith.constant 0 : index
    %18 = vector.load %arg9[%c0_13, %c0_14] : memref<2x64xf32, #tpu.memory_space<vmem>>, vector<2x64xf32>
    tpu.vector_store %arg9[%c0_13, %c0_14], %17 {strides = array<i32>} : memref<2x64xf32, #tpu.memory_space<vmem>>, vector<2x64xf32>,
    %c4_i32 = arith.constant 4 : i32
    %19 = arith.cmpi eq, %arg1, %c4_i32 : i32
    %20 = arith.extui %19 : i1 to i32
    %c0_i32_15 = arith.constant 0 : i32
    %21 = arith.cmpi ne, %20, %c0_i32_15 : i32
    scf.if %21 {
      %c1 = arith.constant 1 : index
      %c0_16 = arith.constant 0 : index
      %22 = vector.load %arg4[%c1, %c0_16] : memref<2x64xf32, #tpu.memory_space<vmem>>, vector<1x64xf32>
      %c0_17 = arith.constant 0 : index
      %c0_18 = arith.constant 0 : index
      %23 = vector.load %arg9[%c0_17, %c0_18] : memref<2x64xf32, #tpu.memory_space<vmem>>, vector<2x64xf32>
      %24 = vector.broadcast %22 : vector<1x64xf32> to vector<2x64xf32>
      %25 = arith.addf %23, %24 : vector<2x64xf32>
      %cst_19 = arith.constant 0.000000e+00 : f32
      %26 = vector.broadcast %cst_19 : f32 to vector<2x64xf32>
      %27 = arith.maximumf %25, %26 : vector<2x64xf32>
      %c0_20 = arith.constant 0 : index
      %c0_21 = arith.constant 0 : index
      %28 = vector.load %arg6[%c0_20, %c0_21] : memref<64x128xf32, #tpu.memory_space<vmem>>, vector<64x128xf32>
      %cst_22 = arith.constant dense<0.000000e+00> : vector<2x128xf32>
      %29 = tpu.matmul %27, %28, %cst_22 {dimension_numbers = #tpu.dot_dimension_numbers<[1], [0], [0], [1], [0, 0, 1, 1], [], []>} : vector<2x64xf32>, vector<64x128xf32>, vector<2x128xf32> -> vector<2x128xf32>
      %c0_23 = arith.constant 0 : index
      %c0_24 = arith.constant 0 : index
      %30 = vector.load %arg7[%c0_23, %c0_24] : memref<1x128xf32, #tpu.memory_space<vmem>>, vector<1x128xf32>
      %31 = vector.broadcast %30 : vector<1x128xf32> to vector<2x128xf32>
      %32 = arith.addf %29, %31 : vector<2x128xf32>
      %c0_25 = arith.constant 0 : index
      %c0_26 = arith.constant 0 : index
      %33 = vector.load %arg8[%c0_25, %c0_26] : memref<2x128xf32, #tpu.memory_space<vmem>>, vector<2x128xf32>
      tpu.vector_store %arg8[%c0_25, %c0_26], %32 {strides = array<i32>} : memref<2x128xf32, #tpu.memory_space<vmem>>, vector<2x128xf32>,
    } else {
    }
    return
  }
  func.func @transform_0(%arg0: i32, %arg1: i32) -> (i32, i32) {
    %c0_i32 = arith.constant 0 : i32
    return %arg0, %arg1 : i32, i32
  }
  func.func @transform_1(%arg0: i32, %arg1: i32) -> (i32, i32) {
    %c0_i32 = arith.constant 0 : i32
    %c0_i32_0 = arith.constant 0 : i32
    %c0_i32_1 = arith.constant 0 : i32
    return %c0_i32, %c0_i32_0 : i32, i32
  }
  func.func @transform_2(%arg0: i32, %arg1: i32) -> (i32, i32) {
    %c0_i32 = arith.constant 0 : i32
    %c0_i32_0 = arith.constant 0 : i32
    %c0_i32_1 = arith.constant 0 : i32
    return %c0_i32, %c0_i32_0 : i32, i32
  }
  func.func @transform_3(%arg0: i32, %arg1: i32) -> (i32, i32, i32) {
    %c0_i32 = arith.constant 0 : i32
    %c0_i32_0 = arith.constant 0 : i32
    %c0_i32_1 = arith.constant 0 : i32
    return %arg1, %c0_i32, %c0_i32_0 : i32, i32, i32
  }
  func.func @transform_4(%arg0: i32, %arg1: i32) -> (i32, i32) {
    %c0_i32 = arith.constant 0 : i32
    %c0_i32_0 = arith.constant 0 : i32
    %c0_i32_1 = arith.constant 0 : i32
    return %c0_i32, %c0_i32_0 : i32, i32
  }
  func.func @transform_5(%arg0: i32, %arg1: i32) -> (i32, i32) {
    %c0_i32 = arith.constant 0 : i32
    %c0_i32_0 = arith.constant 0 : i32
    %c0_i32_1 = arith.constant 0 : i32
    return %c0_i32, %c0_i32_0 : i32, i32
  }
  func.func @transform_6(%arg0: i32, %arg1: i32) -> (i32, i32) {
    %c0_i32 = arith.constant 0 : i32
    %c0_i32_0 = arith.constant 0 : i32
    return %arg0, %c0_i32 : i32, i32
  }
}

</mosaic_0001>

<bundles_post_ra>
// kernel: tpu_custom_call.1
= control target key start
LH: loop header
LB: loop body
LE: loop exit
PB: predicated region body
PF: predicated region fallthrough
CT: control target
= control target key end

     0   :  { %11 = vsyncpa [#allocation4], 0  ;;  %s3775_s21 = smov 0   ;;  %s3777_s22 = smov 0   ;;  %s4522_s0 = inlined_call_operand.vmem [shape: f32[2,16000], index: 0, kind: input, shape index: {}]   ;;  %s4523_s1 = inlined_call_operand.vmem [shape: bf16[3200,64], index: 1, kind: input, shape index: {}]   ;;  %s4524_s2 = inlined_call_operand.vmem [shape: f32[2,64], index: 2, kind: input, shape index: {}]   ;;  %s4525_s3 = inlined_call_operand.vmem [shape: bf16[5,64,64], index: 3, kind: input, shape index: {}]   ;;  %s4526_s4 = inlined_call_operand.vmem [shape: f32[64,128], index: 4, kind: input, shape index: {}]   ;;  %s4527_s5 = inlined_call_operand.vmem [shape: f32[1,128], index: 5, kind: input, shape index: {}]   ;;  %s4528_s6 = inlined_call_operand.hbm [shape: f32[2,128], index: 6, kind: output, shape index: {}]  }
   0x1   :  { %s3779_s23 = smov 0  }
   0x2 LB: > { %s2856_s24 = sadd.s32 4294967295, %s3730_s23   ;;  %s26_s25 = sadd.s32 1, %s3726_s22  ;;  %s3730_s23 = sphi %s3779_s23, %s17_s23   ;;  %s3726_s22 = sphi %s3777_s22, %s4531_s22   ;;  %s3722_s21 = sphi %s3775_s21, %s4530_s21  }
   0x3   : > { %p27_p0 = scmp.ge.s32.totalorder %s26_s25, 5  ;;  %p2859_p1 = scmp.ge.s32.totalorder %s3730_s23, 1 }
   0x4   : > { %p242_p2 = scmp.lt.s32.totalorder %s3730_s23, 6 }
   0x5   : > { %s4533_s25 = smov (%p27_p0, %s26_s25), 0 }
   0x6   : > { %p243_p3 = pnand %p2859_p1, %p242_p2 }
   0x7   : > { %s276_s26 = smul.u32 (!%p243_p3), 25, %s3722_s21  ;;  %p286_p4 = scmp.lt.s32.totalorder (!%p243_p3), %s3722_s21, 4 }
   0x8   : > { %246 = sbr.rel (%p243_p3) target bundleno = 932 (0x3a4), region = 44  ;;  %p2863_p6 = scmp.ne.s32.totalorder (!%p243_p3), %s3722_s21, 0 }
   0x9   : > { %p279_p5 = scmp.lt.s32.totalorder (!%p243_p3), %s276_s26, 124 }
   0xf   : > { %s287_s27 = scalar_select %p286_p4, %s3722_s21, 4 }
  0x10   : > { %s4535_s26 = smov (!%p279_p5, %s276_s26), 124  ;;  %295 = sbr.rel (%p2863_p6) target bundleno = 23 (0x17), region = 48 }
  0x11   : > { %s3079_s28 = sshll.u32 %s287_s27, 5  ;;  %s2860_s29 = sshll.u32 %s4535_s26, 1  ;;  %vm296_vm0 = vcmask (!%p2863_p6), 517120   ;;  %v3732_v0 = vmov (!%p2863_p6), 0.0  }
  0x12   : > { %s3802_s8 = scalar_lea.vmem %s4525_s3, %s3079_s28  ;;  %s3807_s11 = scalar_lea.vmem %s4522_s0, %s2860_s29  ;;  %297 = vst.msk [vmem:[#allocation2] sm:$0x3] (!%p2863_p6), %vm296_vm0, %v3732_v0 }
  0x17 PF: > { %v3468_v1 = vld [vmem:[%s4523_s1 + $0x40] sm:$0xff]   ;;  %v3472_v5 = vld [vmem:[%s4523_s1 + $0x48] sm:$0xff]   ;;  %v3476_v9 = vld [vmem:[%s4523_s1 + $0x50] sm:$0xff]   ;;  %v317_v28 = vlaneseq  ;;  %v3733_v36 = vmov 1983009808   ;;  %vm3735_vm1 = vmmov 0  }
  0x18   : > { %v3469_v2 = vld [vmem:[%s4523_s1] sm:$0xff]   ;;  %3080 = vmatprep.subr.bf16.mxu0 %v3468_v1  ;;  %v3473_v6 = vld [vmem:[%s4523_s1 + $0x8] sm:$0xff]   ;;  %v3477_v10 = vld [vmem:[%s4523_s1 + $0x10] sm:$0xff]   ;;  %v315_v37 = vunpack.c.l.s4 %v3733_v36  ;;  %vm2631_vm2 = vcmask 523264   ;;  %vm2676_vm3 = vcmask 517120   ;;  %p3071_p7 = scmp.ne.s32.totalorder %s3722_s21, 4 }
  0x19   : > { %v3470_v3 = vld [vmem:[%s4523_s1 + $0xc0] sm:$0xff]   ;;  %3081 = vmatpush3.bf16.msra.mxu0 %v3469_v2  ;;  %v3474_v7 = vld [vmem:[%s4523_s1 + $0xc8] sm:$0xff]   ;;  %v3478_v11 = vld [vmem:[%s4523_s1 + $0xd0] sm:$0xff]   ;;  %v318_v33 = vshrl.u32 %v317_v28, 7  ;;  %vm3737_vm4 = vmmov (!%p3071_p7), 0  }
  0x1a   : > { %v3471_v4 = vld [vmem:[%s4523_s1 + $0x80] sm:$0xff]   ;;  %3102 = vmatprep.subr.bf16.mxu1 %v3470_v3  ;;  %3082 = vmatprep.subr.bf16.mxu0 %v3472_v5  ;;  %v3475_v8 = vld [vmem:[%s4523_s1 + $0x88] sm:$0xff]   ;;  %v3479_v12 = vld [vmem:[%s4523_s1 + $0x90] sm:$0xff]   ;;  %v316_v39 = vunpack.c.0.s8 %v315_v37 }
  0x1b   : > { %3103 = vmatpush3.bf16.msra.mxu1 %v3471_v4  ;;  %v3480_v13 = vld [vmem:[%s4523_s1 + $0x58] sm:$0xff]   ;;  %v3484_v17 = vld [vmem:[%s4523_s1 + $0x60] sm:$0xff]   ;;  %v3488_v21 = vld [vmem:[%s4523_s1 + $0x68] sm:$0xff]  }
  0x1c   : > { %3104 = vmatprep.subr.bf16.mxu1 %v3474_v7  ;;  %v3481_v14 = vld [vmem:[%s4523_s1 + $0x18] sm:$0xff]   ;;  %v3485_v18 = vld [vmem:[%s4523_s1 + $0x20] sm:$0xff]   ;;  %v3489_v22 = vld [vmem:[%s4523_s1 + $0x28] sm:$0xff]   ;;  %v3913_v42 = vsub.s32 %v316_v39, %v318_v33 }
  0x1d   : > { %3083 = vmatpush3.bf16.msra.mxu0 %v3473_v6  ;;  %v3482_v15 = vld [vmem:[%s4523_s1 + $0xd8] sm:$0xff]   ;;  %v3486_v19 = vld [vmem:[%s4523_s1 + $0xe0] sm:$0xff]   ;;  %v3490_v23 = vld [vmem:[%s4523_s1 + $0xe8] sm:$0xff]  }
  0x1e   : > { %3084 = vmatprep.subr.bf16.mxu0 %v3476_v9  ;;  %v3483_v16 = vld [vmem:[%s4523_s1 + $0x98] sm:$0xff]   ;;  %v3487_v20 = vld [vmem:[%s4523_s1 + $0xa0] sm:$0xff]   ;;  %v3491_v24 = vld [vmem:[%s4523_s1 + $0xa8] sm:$0xff]  }
  0x1f   : > { %3105 = vmatpush3.bf16.msra.mxu1 %v3475_v8  ;;  %v3492_v25 = vld [vmem:[%s4523_s1 + $0x70] sm:$0xff]   ;;  %v3496_v30 = vld [vmem:[%s4523_s1 + $0x78] sm:$0xff]   ;;  %v299_v34 = vld [vmem:[%s3807_s11] sm:$0xff] }
  0x20   : > { %3106 = vmatprep.subr.bf16.mxu1 %v3478_v11  ;;  %v3493_v26 = vld [vmem:[%s4523_s1 + $0x30] sm:$0xff]   ;;  %v3497_v31 = vld [vmem:[%s4523_s1 + $0x38] sm:$0xff]   ;;  %v3500_v38 = vld [vmem:[%s4523_s1 + $0x140] sm:$0xff]   ;;  %v313_v40 = vcombine.high %v299_v34, %v299_v34  ;;  %v320_v43 = vrot.slane %v299_v34, %v3913_v42 }
  0x21   : > { %3085 = vmatpush3.bf16.msra.mxu0 %v3477_v10  ;;  %v3494_v27 = vld [vmem:[%s4523_s1 + $0xf0] sm:$0xff]   ;;  %v3498_v32 = vld [vmem:[%s4523_s1 + $0xf8] sm:$0xff]   ;;  %v3503_v41 = vld [vmem:[%s4523_s1 + $0x1c0] sm:$0xff]  }
  0x22   : > { %3086 = vmatprep.subr.bf16.mxu0 %v3480_v13  ;;  %v3495_v29 = vld [vmem:[%s4523_s1 + $0xb0] sm:$0xff]   ;;  %v3499_v35 = vld [vmem:[%s4523_s1 + $0xb8] sm:$0xff]   ;;  %v327_v44 = vrot.slane %v313_v40, %v3913_v42  ;;  %v328_v45 = vcombine.high %v320_v43, %v320_v43  ;;  %v3502_v47 = vld [vmem:[%s4523_s1 + $0x100] sm:$0xff]   ;;  %v447_v48 = vpack.c.bf16 %v320_v43, %v320_v43 }
  0x23   : > { %3107 = vmatpush3.bf16.msra.mxu1 %v3479_v12  ;;  %v3504_v50 = vld [vmem:[%s4523_s1 + $0x180] sm:$0xff]   ;;  %v3505_v53 = vld [vmem:[%s4523_s1 + $0x148] sm:$0xff]   ;;  %v3509_v57 = vld [vmem:[%s4523_s1 + $0x150] sm:$0xff]  }
  0x24   : > { %3108 = vmatprep.subr.bf16.mxu1 %v3482_v15  ;;  %v329_v46 = vcombine.high %v327_v44, %v327_v44  ;;  %v449_v49 = vpack.c.bf16 %v327_v44, %v327_v44  ;;  %v448_v51 = vpack.c.bf16 %v328_v45, %v328_v45  ;;  %v3507_v54 = vld [vmem:[%s4523_s1 + $0x1c8] sm:$0xff]   ;;  %v3511_v58 = vld [vmem:[%s4523_s1 + $0x1d0] sm:$0xff]   ;;  %v3513_v61 = vld [vmem:[%s4523_s1 + $0x158] sm:$0xff]  }
  0x25   : > { %3087 = vmatpush3.bf16.msra.mxu0 %v3481_v14  ;;  %v3506_v55 = vld [vmem:[%s4523_s1 + $0x108] sm:$0xff]   ;;  %v3510_v59 = vld [vmem:[%s4523_s1 + $0x110] sm:$0xff]   ;;  %v3515_v62 = vld [vmem:[%s4523_s1 + $0x1d8] sm:$0xff]  }
  0x26   : > { %3088 = vmatprep.subr.bf16.mxu0 %v3484_v17  ;;  %v450_v52 = vpack.c.bf16 %v329_v46, %v329_v46  ;;  %2108 = vmatprep.mubr.bf16.mxu0 %v448_v51  ;;  %v3508_v56 = vld [vmem:[%s4523_s1 + $0x188] sm:$0xff]   ;;  %v3512_v60 = vld [vmem:[%s4523_s1 + $0x190] sm:$0xff]   ;;  %v3514_v63 = vld [vmem:[%s4523_s1 + $0x118] sm:$0xff]  }
  0x27   : > { %3109 = vmatpush3.bf16.msra.mxu1 %v3483_v16  ;;  %v3516_v0 = vld [vmem:[%s4523_s1 + $0x198] sm:$0xff]   ;;  %v3517_v1 = vld [vmem:[%s4523_s1 + $0x160] sm:$0xff]   ;;  %v3521_v5 = vld [vmem:[%s4523_s1 + $0x168] sm:$0xff]  }
  0x28   : > { %3110 = vmatprep.subr.bf16.mxu1 %v3486_v19  ;;  %2148 = vmatprep.mubr.bf16.mxu1 %v450_v52  ;;  %v3519_v2 = vld [vmem:[%s4523_s1 + $0x1e0] sm:$0xff]   ;;  %v3523_v6 = vld [vmem:[%s4523_s1 + $0x1e8] sm:$0xff]   ;;  %v3525_v9 = vld [vmem:[%s4523_s1 + $0x170] sm:$0xff]  }
  0x29   : > { %3089 = vmatpush3.bf16.msra.mxu0 %v3485_v18  ;;  %v3518_v3 = vld [vmem:[%s4523_s1 + $0x120] sm:$0xff]   ;;  %v3522_v7 = vld [vmem:[%s4523_s1 + $0x128] sm:$0xff]   ;;  %v3527_v10 = vld [vmem:[%s4523_s1 + $0x1f0] sm:$0xff]  }
  0x2a   : > { %3090 = vmatprep.subr.bf16.mxu0 %v3488_v21  ;;  %v3520_v4 = vld [vmem:[%s4523_s1 + $0x1a0] sm:$0xff]   ;;  %v3524_v8 = vld [vmem:[%s4523_s1 + $0x1a8] sm:$0xff]   ;;  %v3526_v12 = vld [vmem:[%s4523_s1 + $0x130] sm:$0xff]  }
  0x2b   : > { %3111 = vmatpush3.bf16.msra.mxu1 %v3487_v20  ;;  %v300_v11 = vld [vmem:[%s3807_s11 + $0x8] sm:$0xff]  ;;  %v3528_v15 = vld [vmem:[%s4523_s1 + $0x1b0] sm:$0xff]   ;;  %v3529_v16 = vld [vmem:[%s4523_s1 + $0x178] sm:$0xff]  }
  0x2c   : > { %3112 = vmatprep.subr.bf16.mxu1 %v3490_v23  ;;  %v337_v13 = vrot.slane %v300_v11, %v3913_v42  ;;  %v330_v14 = vcombine.high %v300_v11, %v300_v11  ;;  %v3531_v19 = vld [vmem:[%s4523_s1 + $0x1f8] sm:$0xff]   ;;  %v3539_v33 = vld [vmem:[%s4523_s1 + $0x208] sm:$0xff]   ;;  %v3544_v36 = vld [vmem:[%s4523_s1 + $0x2d0] sm:$0xff]  }
  0x2d   : > { %3091 = vmatpush3.bf16.msra.mxu0 %v3489_v22  ;;  %v3530_v20 = vld [vmem:[%s4523_s1 + $0x138] sm:$0xff]   ;;  %v3541_v34 = vld [vmem:[%s4523_s1 + $0x288] sm:$0xff]   ;;  %v3543_v37 = vld [vmem:[%s4523_s1 + $0x210] sm:$0xff]  }
  0x2e   : > { %3092 = vmatprep.subr.bf16.mxu0 %v3492_v25  ;;  %v345_v17 = vcombine.high %v337_v13, %v337_v13  ;;  %v344_v18 = vrot.slane %v330_v14, %v3913_v42  ;;  %v3532_v23 = vld [vmem:[%s4523_s1 + $0x1b8] sm:$0xff]   ;;  %v451_v28 = vpack.c.bf16 %v337_v13, %v337_v13  ;;  %v3550_v44 = vld [vmem:[%s4523_s1 + $0x260] sm:$0xff]   ;;  %v3557_v51 = vld [vmem:[%s4523_s1 + $0x2a8] sm:$0xff]  }
  0x2f   : > { %3113 = vmatpush3.bf16.msra.mxu1 %v3491_v24  ;;  %v3533_v24 = vld [vmem:[%s4523_s1 + $0x240] sm:$0xff]   ;;  %v3546_v39 = vld [vmem:[%s4523_s1 + $0x258] sm:$0xff]   ;;  %v3558_v52 = vld [vmem:[%s4523_s1 + $0x270] sm:$0xff]  }
  0x30   : > { %3114 = vmatprep.subr.bf16.mxu1 %v3494_v27  ;;  %v452_v21 = vpack.c.bf16 %v345_v17, %v345_v17  ;;  %v346_v22 = vcombine.high %v344_v18, %v344_v18  ;;  %v3535_v27 = vld [vmem:[%s4523_s1 + $0x200] sm:$0xff]   ;;  %v3548_v40 = vld [vmem:[%s4523_s1 + $0x2d8] sm:$0xff]   ;;  %v3573_v11 = vld [vmem:[%s4523_s1 + $0x3c8] sm:$0xff]  }
  0x31   : > { %3093 = vmatpush3.bf16.msra.mxu0 %v3493_v26  ;;  %v3536_v26 = vld [vmem:[%s4523_s1 + $0x2c0] sm:$0xff]   ;;  %v3549_v43 = vld [vmem:[%s4523_s1 + $0x298] sm:$0xff]   ;;  %v3574_v13 = vld [vmem:[%s4523_s1 + $0x388] sm:$0xff]  }
  0x32   : > { %3094 = vmatprep.subr.bf16.mxu0 %v3496_v30  ;;  %v454_v25 = vpack.c.bf16 %v346_v22, %v346_v22  ;;  %v3537_v30 = vld [vmem:[%s4523_s1 + $0x280] sm:$0xff]   ;;  %v3575_v14 = vld [vmem:[%s4523_s1 + $0x350] sm:$0xff]  }
  0x33   : > { %3115 = vmatpush3.bf16.msra.mxu1 %v3495_v29  ;;  %v453_v29 = vpack.c.bf16 %v344_v18, %v344_v18  ;;  %v3552_v45 = vld [vmem:[%s4523_s1 + $0x2e0] sm:$0xff]   ;;  %v3578_v17 = vld [vmem:[%s4523_s1 + $0x390] sm:$0xff]   ;;  %v3579_v18 = vld [vmem:[%s4523_s1 + $0x358] sm:$0xff]  }
  0x34   : > { %3116 = vmatprep.subr.bf16.mxu1 %v3498_v32  ;;  %v3540_v32 = vld [vmem:[%s4523_s1 + $0x2c8] sm:$0xff]   ;;  %v3551_v46 = vld [vmem:[%s4523_s1 + $0x220] sm:$0xff]  }
  0x35   : > { %3095 = vmatpush3.bf16.msra.mxu0 %v3497_v31  ;;  %v3538_v31 = vld [vmem:[%s4523_s1 + $0x248] sm:$0xff]   ;;  %v3583_v22 = vld [vmem:[%s4523_s1 + $0x360] sm:$0xff]  }
  0x36   : > { %3124 = vmatprep.subr.bf16.mxu0 %v3500_v38  ;;  %v3545_v38 = vld [vmem:[%s4523_s1 + $0x290] sm:$0xff]  }
  0x37   : > { %3117 = vmatpush3.bf16.msra.mxu1 %v3499_v35  ;;  %v3542_v35 = vld [vmem:[%s4523_s1 + $0x250] sm:$0xff]  }
  0x38   : > { %3146 = vmatprep.subr.bf16.mxu1 %v3503_v41  ;;  %2109 = vmatmul.mubr.bf16.vlgmr.msra.gmra.mrb[0].mxu0 %v447_v48  ;;  %v3547_v41 = vld [vmem:[%s4523_s1 + $0x218] sm:$0xff]   ;;  %v3554_v48 = vld [vmem:[%s4523_s1 + $0x268] sm:$0xff]  }
  0x39   : > { %3125 = vmatpush3.bf16.msra.mxu0 %v3502_v47  ;;  %2188 = vmatprep.mubr.bf16.mxu0 %v452_v21  ;;  %v3553_v47 = vld [vmem:[%s4523_s1 + $0x2a0] sm:$0xff]   ;;  %v3582_v21 = vld [vmem:[%s4523_s1 + $0x398] sm:$0xff]  }
  0x3a   : > { %2149 = vmatmul.mubr.bf16.vlgmr.msra.gmra.mrb[0].mxu1 %v449_v49  ;;  %3126 = vmatprep.subr.bf16.mxu0 %v3505_v53  ;;  %v3556_v49 = vld [vmem:[%s4523_s1 + $0x2e8] sm:$0xff]   ;;  %v3560_v53 = vld [vmem:[%s4523_s1 + $0x2f0] sm:$0xff]  }
  0x3b   : > { %3147 = vmatpush3.bf16.msra.mxu1 %v3504_v50  ;;  %2228 = vmatprep.mubr.bf16.mxu1 %v454_v25  ;;  %v3555_v50 = vld [vmem:[%s4523_s1 + $0x228] sm:$0xff]   ;;  %v3586_v25 = vld [vmem:[%s4523_s1 + $0x3a0] sm:$0xff]  }
  0x3c   : > { %3148 = vmatprep.subr.bf16.mxu1 %v3507_v54  ;;  %v301_v54 = vld [vmem:[%s3807_s11 + $0x10] sm:$0xff] }
  0x3d   : > { %3127 = vmatpush3.bf16.msra.mxu0 %v3506_v55  ;;  %v3559_v55 = vld [vmem:[%s4523_s1 + $0x230] sm:$0xff]  }
  0x3e   : > { %3128 = vmatprep.subr.bf16.mxu0 %v3509_v57  ;;  %v347_v57 = vcombine.high %v301_v54, %v301_v54 }
  0x3f   : > { %3149 = vmatpush3.bf16.msra.mxu1 %v3508_v56  ;;  %v354_v56 = vrot.slane %v301_v54, %v3913_v42  ;;  %v3606_v54 = vld [vmem:[%s4523_s1 + $0x4c8] sm:$0xff]  }
  0x40   : > { %3150 = vmatprep.subr.bf16.mxu1 %v3511_v58  ;;  %v3561_v58 = vld [vmem:[%s4523_s1 + $0x2b0] sm:$0xff]  }
  0x41   : > { %3129 = vmatpush3.bf16.msra.mxu0 %v3510_v59  ;;  %v3562_v59 = vld [vmem:[%s4523_s1 + $0x278] sm:$0xff]  }
  0x42   : > { %3130 = vmatprep.subr.bf16.mxu0 %v3513_v61  ;;  %v361_v61 = vrot.slane %v347_v57, %v3913_v42  ;;  %v3608_v57 = vld [vmem:[%s4523_s1 + $0x450] sm:$0xff]  }
  0x43   : > { %3151 = vmatpush3.bf16.msra.mxu1 %v3512_v60  ;;  %v362_v60 = vcombine.high %v354_v56, %v354_v56 }
  0x44   : > { %3152 = vmatprep.subr.bf16.mxu1 %v3515_v62  ;;  %v3564_v62 = vld [vmem:[%s4523_s1 + $0x2f8] sm:$0xff]  }
  0x45   : > { %3131 = vmatpush3.bf16.msra.mxu0 %v3514_v63  ;;  %v3563_v63 = vld [vmem:[%s4523_s1 + $0x238] sm:$0xff]  }
  0x46   : > { %3132 = vmatprep.subr.bf16.mxu0 %v3517_v1  ;;  %v363_v1 = vcombine.high %v361_v61, %v361_v61 }
  0x47   : > { %3153 = vmatpush3.bf16.msra.mxu1 %v3516_v0  ;;  %v456_v0 = vpack.c.bf16 %v362_v60, %v362_v60  ;;  %v3611_v60 = vld [vmem:[%s4523_s1 + $0x490] sm:$0xff]  }
  0x48   : > { %3154 = vmatprep.subr.bf16.mxu1 %v3519_v2  ;;  %v3565_v2 = vld [vmem:[%s4523_s1 + $0x2b8] sm:$0xff]  }
  0x49   : > { %3133 = vmatpush3.bf16.msra.mxu0 %v3518_v3  ;;  %v3566_v3 = vld [vmem:[%s4523_s1 + $0x340] sm:$0xff]  }
  0x4a   : > { %3134 = vmatprep.subr.bf16.mxu0 %v3521_v5  ;;  %v3569_v5 = vld [vmem:[%s4523_s1 + $0x3c0] sm:$0xff]  }
  0x4b   : > { %3155 = vmatpush3.bf16.msra.mxu1 %v3520_v4  ;;  %v458_v4 = vpack.c.bf16 %v363_v1, %v363_v1  ;;  %v3616_v1 = vld [vmem:[%s4523_s1 + $0x460] sm:$0xff]  }
  0x4c   : > { %3156 = vmatprep.subr.bf16.mxu1 %v3523_v6  ;;  %v3568_v6 = vld [vmem:[%s4523_s1 + $0x300] sm:$0xff]  }
  0x4d   : > { %3135 = vmatpush3.bf16.msra.mxu0 %v3522_v7  ;;  %v455_v7 = vpack.c.bf16 %v354_v56, %v354_v56  ;;  %v3607_v56 = vld [vmem:[%s4523_s1 + $0x488] sm:$0xff]  }
  0x4e   : > { %3136 = vmatprep.subr.bf16.mxu0 %v3525_v9  ;;  %v3570_v9 = vld [vmem:[%s4523_s1 + $0x380] sm:$0xff]  }
  0x4f   : > { %3157 = vmatpush3.bf16.msra.mxu1 %v3524_v8  ;;  %v457_v8 = vpack.c.bf16 %v361_v61, %v361_v61  ;;  %v3612_v61 = vld [vmem:[%s4523_s1 + $0x458] sm:$0xff]  }
  0x50   : > { %3158 = vmatprep.subr.bf16.mxu1 %v3527_v10  ;;  %v3571_v10 = vld [vmem:[%s4523_s1 + $0x348] sm:$0xff]  }
  0x51   : > { %3137 = vmatpush3.bf16.msra.mxu0 %v3526_v12  ;;  %v3572_v12 = vld [vmem:[%s4523_s1 + $0x308] sm:$0xff]  }
  0x52   : > { %3138 = vmatprep.subr.bf16.mxu0 %v3529_v16  ;;  %v3576_v16 = vld [vmem:[%s4523_s1 + $0x310] sm:$0xff]  }
  0x53   : > { %3159 = vmatpush3.bf16.msra.mxu1 %v3528_v15  ;;  %v3577_v15 = vld [vmem:[%s4523_s1 + $0x3d0] sm:$0xff]  }
  0x54   : > { %3160 = vmatprep.subr.bf16.mxu1 %v3531_v19  ;;  %v3581_v19 = vld [vmem:[%s4523_s1 + $0x3d8] sm:$0xff]  }
  0x55   : > { %3139 = vmatpush3.bf16.msra.mxu0 %v3530_v20  ;;  %v3580_v20 = vld [vmem:[%s4523_s1 + $0x318] sm:$0xff]  }
  0x56   : > { %3168 = vmatprep.subr.bf16.mxu0 %v3533_v24  ;;  %v3584_v24 = vld [vmem:[%s4523_s1 + $0x320] sm:$0xff]  }
  0x57   : > { %3161 = vmatpush3.bf16.msra.mxu1 %v3532_v23  ;;  %v3585_v23 = vld [vmem:[%s4523_s1 + $0x3e0] sm:$0xff]  }
  0x58   : > { %3190 = vmatprep.subr.bf16.mxu1 %v3536_v26  ;;  %2189 = vmatmul.mubr.bf16.vlgmr.msra.gmra.mrb[4].mxu0 %v451_v28  ;;  %v3587_v26 = vld [vmem:[%s4523_s1 + $0x368] sm:$0xff]  }
  0x59   : > { %3169 = vmatpush3.bf16.msra.mxu0 %v3535_v27  ;;  %2268 = vmatprep.mubr.bf16.mxu0 %v456_v0  ;;  %v3589_v27 = vld [vmem:[%s4523_s1 + $0x3e8] sm:$0xff]   ;;  %v3615_v0 = vld [vmem:[%s4523_s1 + $0x498] sm:$0xff]  }
  0x5a   : > { %2229 = vmatmul.mubr.bf16.vlgmr.msra.gmra.mrb[4].mxu1 %v453_v29  ;;  %3170 = vmatprep.subr.bf16.mxu0 %v3538_v31  ;;  %v3588_v28 = vld [vmem:[%s4523_s1 + $0x328] sm:$0xff]   ;;  %v3593_v31 = vld [vmem:[%s4523_s1 + $0x3f0] sm:$0xff]  }
  0x5b   : > { %3191 = vmatpush3.bf16.msra.mxu1 %v3537_v30  ;;  %2308 = vmatprep.mubr.bf16.mxu1 %v458_v4  ;;  %v3590_v29 = vld [vmem:[%s4523_s1 + $0x3a8] sm:$0xff]   ;;  %v3591_v30 = vld [vmem:[%s4523_s1 + $0x370] sm:$0xff]   ;;  %v3619_v4 = vld [vmem:[%s4523_s1 + $0x4a0] sm:$0xff]  }
  0x5c   : > { %3192 = vmatprep.subr.bf16.mxu1 %v3540_v32  ;;  %v3592_v32 = vld [vmem:[%s4523_s1 + $0x330] sm:$0xff]  }
  0x5d   : > { %3171 = vmatpush3.bf16.msra.mxu0 %v3539_v33  ;;  %v302_v33 = vld [vmem:[%s3807_s11 + $0x18] sm:$0xff] }
  0x5e   : > { %3172 = vmatprep.subr.bf16.mxu0 %v3542_v35  ;;  %v371_v35 = vrot.slane %v302_v33, %v3913_v42 }
  0x5f   : > { %3193 = vmatpush3.bf16.msra.mxu1 %v3541_v34  ;;  %v3594_v34 = vld [vmem:[%s4523_s1 + $0x3b0] sm:$0xff]  }
  0x60   : > { %3194 = vmatprep.subr.bf16.mxu1 %v3544_v36  ;;  %v364_v36 = vcombine.high %v302_v33, %v302_v33  ;;  %v3638_v33 = vld [vmem:[%s4523_s1 + $0x508] sm:$0xff]  }
  0x61   : > { %3173 = vmatpush3.bf16.msra.mxu0 %v3543_v37  ;;  %v3595_v37 = vld [vmem:[%s4523_s1 + $0x378] sm:$0xff]  }
  0x62   : > { %3174 = vmatprep.subr.bf16.mxu0 %v3546_v39  ;;  %v379_v39 = vcombine.high %v371_v35, %v371_v35 }
  0x63   : > { %3195 = vmatpush3.bf16.msra.mxu1 %v3545_v38  ;;  %v3597_v38 = vld [vmem:[%s4523_s1 + $0x3f8] sm:$0xff]  }
  0x64   : > { %3196 = vmatprep.subr.bf16.mxu1 %v3548_v40  ;;  %v378_v40 = vrot.slane %v364_v36, %v3913_v42  ;;  %v3643_v36 = vld [vmem:[%s4523_s1 + $0x5d0] sm:$0xff]  }
  0x65   : > { %3175 = vmatpush3.bf16.msra.mxu0 %v3547_v41  ;;  %v3596_v41 = vld [vmem:[%s4523_s1 + $0x338] sm:$0xff]  }
  0x66   : > { %3176 = vmatprep.subr.bf16.mxu0 %v3550_v44  ;;  %v3598_v44 = vld [vmem:[%s4523_s1 + $0x3b8] sm:$0xff]  }
  0x67   : > { %3197 = vmatpush3.bf16.msra.mxu1 %v3549_v43  ;;  %v460_v43 = vpack.c.bf16 %v379_v39, %v379_v39  ;;  %v3645_v39 = vld [vmem:[%s4523_s1 + $0x558] sm:$0xff]  }
  0x68   : > { %3198 = vmatprep.subr.bf16.mxu1 %v3552_v45  ;;  %v380_v45 = vcombine.high %v378_v40, %v378_v40 }
  0x69   : > { %3177 = vmatpush3.bf16.msra.mxu0 %v3551_v46  ;;  %v3599_v46 = vld [vmem:[%s4523_s1 + $0x440] sm:$0xff]  }
  0x6a   : > { %3178 = vmatprep.subr.bf16.mxu0 %v3554_v48  ;;  %v3602_v48 = vld [vmem:[%s4523_s1 + $0x4c0] sm:$0xff]  }
  0x6b   : > { %3199 = vmatpush3.bf16.msra.mxu1 %v3553_v47  ;;  %v462_v47 = vpack.c.bf16 %v380_v45, %v380_v45  ;;  %v3651_v45 = vld [vmem:[%s4523_s1 + $0x5e0] sm:$0xff]  }
  0x6c   : > { %3200 = vmatprep.subr.bf16.mxu1 %v3556_v49  ;;  %v3601_v49 = vld [vmem:[%s4523_s1 + $0x400] sm:$0xff]  }
  0x6d   : > { %3179 = vmatpush3.bf16.msra.mxu0 %v3555_v50  ;;  %v459_v50 = vpack.c.bf16 %v371_v35, %v371_v35  ;;  %v3641_v35 = vld [vmem:[%s4523_s1 + $0x550] sm:$0xff]  }
  0x6e   : > { %3180 = vmatprep.subr.bf16.mxu0 %v3558_v52  ;;  %v3603_v52 = vld [vmem:[%s4523_s1 + $0x480] sm:$0xff]  }
  0x6f   : > { %3201 = vmatpush3.bf16.msra.mxu1 %v3557_v51  ;;  %v461_v51 = vpack.c.bf16 %v378_v40, %v378_v40  ;;  %v3647_v40 = vld [vmem:[%s4523_s1 + $0x5d8] sm:$0xff]  }
  0x70   : > { %3202 = vmatprep.subr.bf16.mxu1 %v3560_v53  ;;  %v3604_v53 = vld [vmem:[%s4523_s1 + $0x448] sm:$0xff]  }
  0x71   : > { %3181 = vmatpush3.bf16.msra.mxu0 %v3559_v55  ;;  %v3605_v55 = vld [vmem:[%s4523_s1 + $0x408] sm:$0xff]  }
  0x72   : > { %3182 = vmatprep.subr.bf16.mxu0 %v3562_v59  ;;  %v3609_v59 = vld [vmem:[%s4523_s1 + $0x410] sm:$0xff]  }
  0x73   : > { %3203 = vmatpush3.bf16.msra.mxu1 %v3561_v58  ;;  %v3610_v58 = vld [vmem:[%s4523_s1 + $0x4d0] sm:$0xff]  }
  0x74   : > { %3204 = vmatprep.subr.bf16.mxu1 %v3564_v62  ;;  %v3614_v62 = vld [vmem:[%s4523_s1 + $0x4d8] sm:$0xff]  }
  0x75   : > { %3183 = vmatpush3.bf16.msra.mxu0 %v3563_v63  ;;  %v3613_v63 = vld [vmem:[%s4523_s1 + $0x418] sm:$0xff]  }
  0x76   : > { %3212 = vmatprep.subr.bf16.mxu0 %v3566_v3  ;;  %v3617_v3 = vld [vmem:[%s4523_s1 + $0x420] sm:$0xff]  }
  0x77   : > { %3205 = vmatpush3.bf16.msra.mxu1 %v3565_v2  ;;  %v3618_v2 = vld [vmem:[%s4523_s1 + $0x4e0] sm:$0xff]  }
  0x78   : > { %3234 = vmatprep.subr.bf16.mxu1 %v3569_v5  ;;  %2269 = vmatmul.mubr.bf16.vlgmr.msra.gmra.mrb[8].mxu0 %v455_v7  ;;  %v3620_v5 = vld [vmem:[%s4523_s1 + $0x468] sm:$0xff]  }
  0x79   : > { %3213 = vmatpush3.bf16.msra.mxu0 %v3568_v6  ;;  %2348 = vmatprep.mubr.bf16.mxu0 %v460_v43  ;;  %v3622_v6 = vld [vmem:[%s4523_s1 + $0x4e8] sm:$0xff]   ;;  %v3648_v43 = vld [vmem:[%s4523_s1 + $0x598] sm:$0xff]  }
  0x7a   : > { %2309 = vmatmul.mubr.bf16.vlgmr.msra.gmra.mrb[8].mxu1 %v457_v8  ;;  %3214 = vmatprep.subr.bf16.mxu0 %v3571_v10  ;;  %v3621_v7 = vld [vmem:[%s4523_s1 + $0x428] sm:$0xff]   ;;  %v3626_v10 = vld [vmem:[%s4523_s1 + $0x4f0] sm:$0xff]  }
  0x7b   : > { %3235 = vmatpush3.bf16.msra.mxu1 %v3570_v9  ;;  %2388 = vmatprep.mubr.bf16.mxu1 %v462_v47  ;;  %v3623_v8 = vld [vmem:[%s4523_s1 + $0x4a8] sm:$0xff]   ;;  %v3624_v9 = vld [vmem:[%s4523_s1 + $0x470] sm:$0xff]   ;;  %v3652_v47 = vld [vmem:[%s4523_s1 + $0x5a0] sm:$0xff]  }
  0x7c   : > { %3236 = vmatprep.subr.bf16.mxu1 %v3573_v11  ;;  %v3625_v11 = vld [vmem:[%s4523_s1 + $0x430] sm:$0xff]  }
  0x7d   : > { %3215 = vmatpush3.bf16.msra.mxu0 %v3572_v12  ;;  %v303_v12 = vld [vmem:[%s3807_s11 + $0x20] sm:$0xff] }
  0x7e   : > { %3216 = vmatprep.subr.bf16.mxu0 %v3575_v14  ;;  %v388_v14 = vrot.slane %v303_v12, %v3913_v42 }
  0x7f   : > { %3237 = vmatpush3.bf16.msra.mxu1 %v3574_v13  ;;  %v3627_v13 = vld [vmem:[%s4523_s1 + $0x4b0] sm:$0xff]  }
  0x80   : > { %3238 = vmatprep.subr.bf16.mxu1 %v3577_v15  ;;  %v381_v15 = vcombine.high %v303_v12, %v303_v12  ;;  %v3672_v12 = vld [vmem:[%s4523_s1 + $0x630] sm:$0xff]  }
  0x81   : > { %3217 = vmatpush3.bf16.msra.mxu0 %v3576_v16  ;;  %v3628_v16 = vld [vmem:[%s4523_s1 + $0x478] sm:$0xff]  }
  0x82   : > { %3218 = vmatprep.subr.bf16.mxu0 %v3579_v18  ;;  %v396_v18 = vcombine.high %v388_v14, %v388_v14 }
  0x83   : > { %3239 = vmatpush3.bf16.msra.mxu1 %v3578_v17  ;;  %v3630_v17 = vld [vmem:[%s4523_s1 + $0x4f8] sm:$0xff]  }
  0x84   : > { %3240 = vmatprep.subr.bf16.mxu1 %v3581_v19  ;;  %v395_v19 = vrot.slane %v381_v15, %v3913_v42 }
  0x85   : > { %3219 = vmatpush3.bf16.msra.mxu0 %v3580_v20  ;;  %v3629_v20 = vld [vmem:[%s4523_s1 + $0x438] sm:$0xff]  }
  0x86   : > { %3220 = vmatprep.subr.bf16.mxu0 %v3583_v22  ;;  %v3631_v22 = vld [vmem:[%s4523_s1 + $0x4b8] sm:$0xff]  }
  0x87   : > { %3241 = vmatpush3.bf16.msra.mxu1 %v3582_v21  ;;  %v464_v21 = vpack.c.bf16 %v396_v18, %v396_v18  ;;  %v2865_v18 = vld [vmem:[%s4524_s2] ss:$0 sm:$0xff] }
  0x88   : > { %3242 = vmatprep.subr.bf16.mxu1 %v3585_v23  ;;  %v397_v23 = vcombine.high %v395_v19, %v395_v19 }
  0x89   : > { %3221 = vmatpush3.bf16.msra.mxu0 %v3584_v24  ;;  %v3632_v24 = vld [vmem:[%s4523_s1 + $0x540] sm:$0xff]  }
  0x8a   : > { %3222 = vmatprep.subr.bf16.mxu0 %v3587_v26  ;;  %v3635_v26 = vld [vmem:[%s4523_s1 + $0x5c0] sm:$0xff]  }
  0x8b   : > { %3243 = vmatpush3.bf16.msra.mxu1 %v3586_v25  ;;  %v466_v25 = vpack.c.bf16 %v397_v23, %v397_v23 }
  0x8c   : > { %3244 = vmatprep.subr.bf16.mxu1 %v3589_v27  ;;  %v3634_v27 = vld [vmem:[%s4523_s1 + $0x500] sm:$0xff]  }
  0x8d   : > { %3223 = vmatpush3.bf16.msra.mxu0 %v3588_v28  ;;  %v463_v28 = vpack.c.bf16 %v388_v14, %v388_v14  ;;  %v2864_v14 = vld.sshfl [vmem:[%s3807_s11 + $0x30] sm:$0x3 pattern:$0x76325410] }
  0x8e   : > { %3224 = vmatprep.subr.bf16.mxu0 %v3591_v30  ;;  %v3636_v30 = vld [vmem:[%s4523_s1 + $0x580] sm:$0xff]   ;;  %v471_v15 = vpack.c.bf16 %v2864_v14, %v2864_v14 }
  0x8f   : > { %3245 = vmatpush3.bf16.msra.mxu1 %v3590_v29  ;;  %v465_v29 = vpack.c.bf16 %v395_v19, %v395_v19 }
  0x90   : > { %3246 = vmatprep.subr.bf16.mxu1 %v3593_v31  ;;  %v3637_v31 = vld [vmem:[%s4523_s1 + $0x548] sm:$0xff]  }
  0x91   : > { %3225 = vmatpush3.bf16.msra.mxu0 %v3592_v32  ;;  %v3639_v32 = vld [vmem:[%s4523_s1 + $0x5c8] sm:$0xff]  }
  0x92   : > { %3226 = vmatprep.subr.bf16.mxu0 %v3595_v37  ;;  %v3642_v37 = vld [vmem:[%s4523_s1 + $0x510] sm:$0xff]  }
  0x93   : > { %3247 = vmatpush3.bf16.msra.mxu1 %v3594_v34  ;;  %v3640_v34 = vld [vmem:[%s4523_s1 + $0x588] sm:$0xff]  }
  0x94   : > { %3248 = vmatprep.subr.bf16.mxu1 %v3597_v38  ;;  %v3644_v38 = vld [vmem:[%s4523_s1 + $0x590] sm:$0xff]  }
  0x95   : > { %3227 = vmatpush3.bf16.msra.mxu0 %v3596_v41  ;;  %v3646_v41 = vld [vmem:[%s4523_s1 + $0x518] sm:$0xff]  }
  0x96   : > { %3256 = vmatprep.subr.bf16.mxu0 %v3599_v46  ;;  %v3650_v46 = vld [vmem:[%s4523_s1 + $0x520] sm:$0xff]  }
  0x97   : > { %3249 = vmatpush3.bf16.msra.mxu1 %v3598_v44  ;;  %v3649_v44 = vld [vmem:[%s4523_s1 + $0x560] sm:$0xff]  }
  0x98   : > { %3278 = vmatprep.subr.bf16.mxu1 %v3602_v48  ;;  %2349 = vmatmul.mubr.bf16.vlgmr.msra.gmra.mrb[12].mxu0 %v459_v50  ;;  %v3653_v48 = vld [vmem:[%s4523_s1 + $0x568] sm:$0xff]  }
  0x99   : > { %3257 = vmatpush3.bf16.msra.mxu0 %v3601_v49  ;;  %2428 = vmatprep.mubr.bf16.mxu0 %v464_v21  ;;  %v3655_v49 = vld [vmem:[%s4523_s1 + $0x5e8] sm:$0xff]  }
  0x9a   : > { %2389 = vmatmul.mubr.bf16.vlgmr.msra.gmra.mrb[12].mxu1 %v461_v51  ;;  %3258 = vmatprep.subr.bf16.mxu0 %v3604_v53  ;;  %v3654_v50 = vld [vmem:[%s4523_s1 + $0x528] sm:$0xff]   ;;  %v3659_v53 = vld [vmem:[%s4523_s1 + $0x5f0] sm:$0xff]  }
  0x9b   : > { %3279 = vmatpush3.bf16.msra.mxu1 %v3603_v52  ;;  %2468 = vmatprep.mubr.bf16.mxu1 %v466_v25  ;;  %v3656_v51 = vld [vmem:[%s4523_s1 + $0x5a8] sm:$0xff]   ;;  %v3657_v52 = vld [vmem:[%s4523_s1 + $0x570] sm:$0xff]  }
  0x9c   : > { %3280 = vmatprep.subr.bf16.mxu1 %v3606_v54  ;;  %v3658_v54 = vld [vmem:[%s4523_s1 + $0x530] sm:$0xff]  }
  0x9d   : > { %3259 = vmatpush3.bf16.msra.mxu0 %v3605_v55  ;;  %v304_v55 = vld [vmem:[%s3807_s11 + $0x28] sm:$0xff] }
  0x9e   : > { %3260 = vmatprep.subr.bf16.mxu0 %v3608_v57  ;;  %v405_v57 = vrot.slane %v304_v55, %v3913_v42 }
  0x9f   : > { %3281 = vmatpush3.bf16.msra.mxu1 %v3607_v56  ;;  %v3660_v56 = vld [vmem:[%s4523_s1 + $0x5b0] sm:$0xff]  }
  0xa0   : > { %3282 = vmatprep.subr.bf16.mxu1 %v3610_v58  ;;  %v398_v58 = vcombine.high %v304_v55, %v304_v55 }
  0xa1   : > { %3261 = vmatpush3.bf16.msra.mxu0 %v3609_v59  ;;  %v3661_v59 = vld [vmem:[%s4523_s1 + $0x578] sm:$0xff]  }
  0xa2   : > { %3262 = vmatprep.subr.bf16.mxu0 %v3612_v61  ;;  %v413_v61 = vcombine.high %v405_v57, %v405_v57 }
  0xa3   : > { %3283 = vmatpush3.bf16.msra.mxu1 %v3611_v60  ;;  %v3663_v60 = vld [vmem:[%s4523_s1 + $0x5f8] sm:$0xff]  }
  0xa4   : > { %3284 = vmatprep.subr.bf16.mxu1 %v3614_v62  ;;  %v412_v62 = vrot.slane %v398_v58, %v3913_v42  ;;  %v3666_v42 = vld [vmem:[%s4523_s1 + $0x600] sm:$0xff]  }
  0xa5   : > { %3263 = vmatpush3.bf16.msra.mxu0 %v3613_v63  ;;  %v3662_v63 = vld [vmem:[%s4523_s1 + $0x538] sm:$0xff]  }
  0xa6   : > { %3264 = vmatprep.subr.bf16.mxu0 %v3616_v1  ;;  %v414_v1 = vcombine.high %v412_v62, %v412_v62 }
  0xa7   : > { %3285 = vmatpush3.bf16.msra.mxu1 %v3615_v0  ;;  %v468_v0 = vpack.c.bf16 %v413_v61, %v413_v61 }
  0xa8   : > { %3286 = vmatprep.subr.bf16.mxu1 %v3618_v2  ;;  %v3664_v2 = vld [vmem:[%s4523_s1 + $0x5b8] sm:$0xff]  }
  0xa9   : > { %3265 = vmatpush3.bf16.msra.mxu0 %v3617_v3  ;;  %v470_v3 = vpack.c.bf16 %v414_v1, %v414_v1 }
  0xaa   : > { %3266 = vmatprep.subr.bf16.mxu0 %v3620_v5  ;;  %v469_v5 = vpack.c.bf16 %v412_v62, %v412_v62 }
  0xab   : > { %3287 = vmatpush3.bf16.msra.mxu1 %v3619_v4  ;;  %v467_v4 = vpack.c.bf16 %v405_v57, %v405_v57 }
  0xac   : > { %3288 = vmatprep.subr.bf16.mxu1 %v3622_v6  ;;  %v3734_v6 = vmov 0.0  }
  0xad   : > { %3267 = vmatpush3.bf16.msra.mxu0 %v3621_v7  ;;  %v3667_v7 = vld [vmem:[%s4523_s1 + $0x608] sm:$0xff]  }
  0xae   : > { %3268 = vmatprep.subr.bf16.mxu0 %v3624_v9  ;;  %v3669_v9 = vld [vmem:[%s4523_s1 + $0x618] sm:$0xff]  }
  0xaf   : > { %3289 = vmatpush3.bf16.msra.mxu1 %v3623_v8  ;;  %v3668_v8 = vld [vmem:[%s4523_s1 + $0x610] sm:$0xff]  }
  0xb0   : > { %3290 = vmatprep.subr.bf16.mxu1 %v3626_v10  ;;  %v3670_v10 = vld [vmem:[%s4523_s1 + $0x620] sm:$0xff]  }
  0xb1   : > { %3269 = vmatpush3.bf16.msra.mxu0 %v3625_v11  ;;  %v3671_v11 = vld [vmem:[%s4523_s1 + $0x628] sm:$0xff]  }
  0xb2   : > { %3270 = vmatprep.subr.bf16.mxu0 %v3628_v16 }
  0xb3   : > { %3291 = vmatpush3.bf16.msra.mxu1 %v3627_v13  ;;  %v3673_v13 = vld [vmem:[%s4523_s1 + $0x638] sm:$0xff]  }
  0xb4   : > { %3292 = vmatprep.subr.bf16.mxu1 %v3630_v17 }
  0xb5   : > { %3271 = vmatpush3.bf16.msra.mxu0 %v3629_v20 }
  0xb6   : > { %3300 = vmatprep.subr.bf16.mxu0 %v3632_v24 }
  0xb7   : > { %3293 = vmatpush3.bf16.msra.mxu1 %v3631_v22 }
  0xb8   : > { %3322 = vmatprep.subr.bf16.mxu1 %v3635_v26  ;;  %2429 = vmatmul.mubr.bf16.vlgmr.msra.gmra.mrb[16].mxu0 %v463_v28 }
  0xb9   : > { %3301 = vmatpush3.bf16.msra.mxu0 %v3634_v27  ;;  %2508 = vmatprep.mubr.bf16.mxu0 %v468_v0 }
  0xba   : > { %2469 = vmatmul.mubr.bf16.vlgmr.msra.gmra.mrb[16].mxu1 %v465_v29  ;;  %3302 = vmatprep.subr.bf16.mxu0 %v3637_v31 }
  0xbb   : > { %3323 = vmatpush3.bf16.msra.mxu1 %v3636_v30  ;;  %2548 = vmatprep.mubr.bf16.mxu1 %v470_v3 }
  0xbc   : > { %3324 = vmatprep.subr.bf16.mxu1 %v3639_v32 }
  0xbd   : > { %3303 = vmatpush3.bf16.msra.mxu0 %v3638_v33 }
  0xbe   : > { %3304 = vmatprep.subr.bf16.mxu0 %v3641_v35 }
  0xbf   : > { %3325 = vmatpush3.bf16.msra.mxu1 %v3640_v34 }
  0xc0   : > { %3326 = vmatprep.subr.bf16.mxu1 %v3643_v36 }
  0xc1   : > { %3305 = vmatpush3.bf16.msra.mxu0 %v3642_v37 }
  0xc2   : > { %3306 = vmatprep.subr.bf16.mxu0 %v3645_v39 }
  0xc3   : > { %3327 = vmatpush3.bf16.msra.mxu1 %v3644_v38 }
  0xc4   : > { %3328 = vmatprep.subr.bf16.mxu1 %v3647_v40  ;;  %v3674_v40 = vld [vmem:[%s3802_s8] sm:$0xff]  }
  0xc5   : > { %3307 = vmatpush3.bf16.msra.mxu0 %v3646_v41 }
  0xc6   : > { %3308 = vmatprep.subr.bf16.mxu0 %v3649_v44  ;;  %v3676_v44 = vld [vmem:[%s3802_s8 + $0x10] sm:$0xff]  }
  0xc7   : > { %3329 = vmatpush3.bf16.msra.mxu1 %v3648_v43  ;;  %v3675_v43 = vld [vmem:[%s3802_s8 + $0x8] sm:$0xff]  }
  0xc8   : > { %3330 = vmatprep.subr.bf16.mxu1 %v3651_v45 }
  0xc9   : > { %3309 = vmatpush3.bf16.msra.mxu0 %v3650_v46 }
  0xca   : > { %3310 = vmatprep.subr.bf16.mxu0 %v3653_v48 }
  0xcb   : > { %3331 = vmatpush3.bf16.msra.mxu1 %v3652_v47 }
  0xcc   : > { %3332 = vmatprep.subr.bf16.mxu1 %v3655_v49 }
  0xcd   : > { %3311 = vmatpush3.bf16.msra.mxu0 %v3654_v50 }
  0xce   : > { %3312 = vmatprep.subr.bf16.mxu0 %v3657_v52 }
  0xcf   : > { %3333 = vmatpush3.bf16.msra.mxu1 %v3656_v51 }
  0xd0   : > { %3334 = vmatprep.subr.bf16.mxu1 %v3659_v53  ;;  %v3677_v53 = vld [vmem:[%s3802_s8 + $0x18] sm:$0xff]  }
  0xd1   : > { %3313 = vmatpush3.bf16.msra.mxu0 %v3658_v54 }
  0xd2   : > { %3314 = vmatprep.subr.bf16.mxu0 %v3661_v59 }
  0xd3   : > { %3335 = vmatpush3.bf16.msra.mxu1 %v3660_v56 }
  0xd4   : > { %3336 = vmatprep.subr.bf16.mxu1 %v3663_v60 }
  0xd5   : > { %3315 = vmatpush3.bf16.msra.mxu0 %v3662_v63 }
  0xd6   : > { %3367 = vmatprep.subr.bf16.mxu0 %v3734_v6 }
  0xd7   : > { %3337 = vmatpush3.bf16.msra.mxu1 %v3664_v2 }
  0xd8   : > { %3387 = vmatprep.subr.bf16.mxu1 %v3734_v6  ;;  %2509 = vmatmul.mubr.bf16.vlgmr.msra.gmra.mrb[20].mxu0 %v467_v4 }
  0xd9   : > { %3368 = vmatpush3.bf16.msra.mxu0 %v3666_v42  ;;  %3383 = vmatprep.mubr.msk.bf16.mxu0 %vm3735_vm1, %v3734_v6 }
  0xda   : > { %2549 = vmatmul.mubr.bf16.vlgmr.msra.gmra.mrb[20].mxu1 %v469_v5  ;;  %3369 = vmatprep.subr.bf16.mxu0 %v3734_v6 }
  0xdb   : > { %3395 = vmatprep.mubr.msk.bf16.mxu1 %vm3735_vm1, %v3734_v6  ;;  %3388 = vmatpush3.bf16.msra.mxu1 %v3674_v40 }
  0xdc   : > { %3389 = vmatprep.subr.bf16.mxu1 %v3734_v6 }
  0xdd   : > { %3370 = vmatpush3.bf16.msra.mxu0 %v3667_v7 }
  0xde   : > { %3371 = vmatprep.subr.bf16.mxu0 %v3734_v6 }
  0xdf   : > { %3390 = vmatpush3.bf16.msra.mxu1 %v3675_v43  ;;  %v2690_v43 = vld [vmem:[%s4526_s4] sm:$0xff] (!%p3071_p7) }
  0xe0   : > { %3391 = vmatprep.subr.bf16.mxu1 %v3734_v6 }
  0xe1   : > { %3372 = vmatpush3.bf16.msra.mxu0 %v3668_v8 }
  0xe2   : > { %3373 = vmatprep.subr.bf16.mxu0 %v3734_v6 }
  0xe3   : > { %3392 = vmatpush3.bf16.msra.mxu1 %v3676_v44  ;;  %v2691_v44 = vld [vmem:[%s4526_s4 + $0x8] sm:$0xff] (!%p3071_p7) }
  0xe4   : > { %3393 = vmatprep.subr.bf16.mxu1 %v3734_v6 }
  0xe5   : > { %3374 = vmatpush3.bf16.msra.mxu0 %v3669_v9 }
  0xe6   : > { %3375 = vmatprep.subr.bf16.mxu0 %v3734_v6 }
  0xe7   : > { %3394 = vmatpush3.bf16.msra.mxu1 %v3677_v53 }
  0xe9   : > { %3376 = vmatpush3.bf16.msra.mxu0 %v3670_v10 }
  0xea   : > { %3377 = vmatprep.subr.bf16.mxu0 %v3734_v6 }
  0xed   : > { %3378 = vmatpush3.bf16.msra.mxu0 %v3671_v11 }
  0xee   : > { %3379 = vmatprep.subr.bf16.mxu0 %v3734_v6 }
  0xf1   : > { %3380 = vmatpush3.bf16.msra.mxu0 %v3672_v12 }
  0xf2   : > { %3381 = vmatprep.subr.bf16.mxu0 %v3734_v6 }
  0xf5   : > { %3382 = vmatpush3.bf16.msra.mxu0 %v3673_v13 }
  0xf8   : > { %3384 = vmatmul.mubr.bf16.vlgmr.msra.gmra.mrb[24].mxu0 %v471_v15 }
 0x10b   : > { %v3096_v16 = vpop.f32.mrb[0].mxu0 }
 0x10c   : > { %v3097_v19 = vpop.f32.mrb[1].mxu0 }
 0x10d   : > { %v3118_v17 = vpop.f32.mrb[0].mxu1  ;;  %v3098_v21 = vadd.f32 %v3097_v19, %v3096_v16  ;;  %v3099_v22 = vpop.f32.mrb[2].mxu0 }
 0x10e   : > { %v3119_v20 = vpop.f32.mrb[1].mxu1  ;;  %v3100_v25 = vpop.f32.mrb[3].mxu0 }
 0x10f   : > { %v3120_v23 = vadd.f32 %v3119_v20, %v3118_v17  ;;  %v3121_v24 = vpop.f32.mrb[2].mxu1  ;;  %v2111_v27 = vadd.f32 %v3098_v21, %v2865_v18 }
 0x110   : > { %v3122_v26 = vpop.f32.mrb[3].mxu1 }
 0x111   : > { %v2151_v28 = vadd.f32 %v3120_v23, %v2111_v27 }
 0x12b   : > { %v3140_v29 = vpop.f32.mrb[4].mxu0 }
 0x12c   : > { %v3141_v31 = vpop.f32.mrb[5].mxu0 }
 0x12d   : > { %v3162_v30 = vpop.f32.mrb[4].mxu1  ;;  %v3142_v33 = vadd.f32 %v3141_v31, %v3140_v29  ;;  %v3143_v34 = vpop.f32.mrb[6].mxu0 }
 0x12e   : > { %v3163_v32 = vpop.f32.mrb[5].mxu1  ;;  %v3144_v37 = vpop.f32.mrb[7].mxu0 }
 0x12f   : > { %v3164_v35 = vadd.f32 %v3163_v32, %v3162_v30  ;;  %v3165_v36 = vpop.f32.mrb[6].mxu1  ;;  %v2191_v39 = vadd.f32 %v3142_v33, %v2151_v28 }
 0x130   : > { %v3166_v38 = vpop.f32.mrb[7].mxu1  ;;  %v2597_v36 = vld [vmem:[#allocation2] sm:$0x3] }
 0x131   : > { %v2231_v41 = vadd.f32 %v3164_v35, %v2191_v39 }
 0x14b   : > { %v3184_v45 = vpop.f32.mrb[8].mxu0 }
 0x14c   : > { %v3185_v47 = vpop.f32.mrb[9].mxu0 }
 0x14d   : > { %v3206_v46 = vpop.f32.mrb[8].mxu1  ;;  %v3186_v49 = vadd.f32 %v3185_v47, %v3184_v45  ;;  %v3187_v50 = vpop.f32.mrb[10].mxu0  ;;  %v2692_v45 = vld [vmem:[%s4526_s4 + $0x10] sm:$0xff] (!%p3071_p7)  ;;  %v3419_v47 = vpack.c.bf16 (!%p3071_p7), %v2691_v44, %v2690_v43 }
 0x14e   : > { %v3207_v48 = vpop.f32.mrb[9].mxu1  ;;  %v3188_v54 = vpop.f32.mrb[11].mxu0 }
 0x14f   : > { %v3208_v51 = vadd.f32 %v3207_v48, %v3206_v46  ;;  %v3209_v52 = vpop.f32.mrb[10].mxu1  ;;  %v2271_v56 = vadd.f32 %v3186_v49, %v2231_v41  ;;  %v3736_v46 = vmov (!%p3071_p7), 0.0|0.0   ;;  %v2693_v48 = vld [vmem:[%s4526_s4 + $0x18] sm:$0xff] (!%p3071_p7)  ;;  %v3738_v49 = vmov (!%p3071_p7), 0.0   ;;  %v3072_v54 = vld [vmem:[%s4524_s2 + $0x1] ss:$0 sm:$0xff] (!%p3071_p7) }
 0x150   : > { %v3210_v55 = vpop.f32.mrb[11].mxu1  ;;  %3418 = vmatprep.subr.bf16.mxu0 (!%p3071_p7), %v3736_v46  ;;  %3415 = vmatprep.mubr.msk.f32.mxu0 (!%p3071_p7), %vm3737_vm4, %v3738_v49  ;;  %v3422_v50 = vpack.c.bf16 (!%p3071_p7), %v2693_v48, %v2692_v45  ;;  %v2695_v52 = vld [vmem:[%s4526_s4 + $0x28] sm:$0xff] (!%p3071_p7) }
 0x151   : > { %v2311_v57 = vadd.f32 %v3208_v51, %v2271_v56  ;;  %3420 = vmatpush3.bf16.msra.mxu0 (!%p3071_p7), %v3419_v47  ;;  %v2694_v51 = vld [vmem:[%s4526_s4 + $0x20] sm:$0xff] (!%p3071_p7)  ;;  %v2696_v56 = vld [vmem:[%s4526_s4 + $0x30] sm:$0xff] (!%p3071_p7) }
 0x152   : > { %3421 = vmatprep.subr.bf16.mxu0 (!%p3071_p7), %v3736_v46  ;;  %v3425_v53 = vpack.c.bf16 (!%p3071_p7), %v2695_v52, %v2694_v51 }
 0x155   : > { %3423 = vmatpush3.bf16.msra.mxu0 (!%p3071_p7), %v3422_v50 }
 0x156   : > { %3424 = vmatprep.subr.bf16.mxu0 (!%p3071_p7), %v3736_v46 }
 0x159   : > { %3426 = vmatpush3.bf16.msra.mxu0 (!%p3071_p7), %v3425_v53 }
 0x15a   : > { %3427 = vmatprep.subr.bf16.mxu0 (!%p3071_p7), %v3736_v46 }
 0x16b   : > { %v3228_v58 = vpop.f32.mrb[12].mxu0 }
 0x16c   : > { %v3229_v60 = vpop.f32.mrb[13].mxu0 }
 0x16d   : > { %v3250_v59 = vpop.f32.mrb[12].mxu1  ;;  %v3230_v62 = vadd.f32 %v3229_v60, %v3228_v58  ;;  %v3231_v63 = vpop.f32.mrb[14].mxu0 }
 0x16e   : > { %v3251_v61 = vpop.f32.mrb[13].mxu1  ;;  %v3232_v2 = vpop.f32.mrb[15].mxu0 }
 0x16f   : > { %v3252_v0 = vadd.f32 %v3251_v61, %v3250_v59  ;;  %v3253_v1 = vpop.f32.mrb[14].mxu1  ;;  %v2351_v4 = vadd.f32 %v3230_v62, %v2311_v57  ;;  %v2697_v57 = vld [vmem:[%s4526_s4 + $0x38] sm:$0xff] (!%p3071_p7)  ;;  %v3073_v61 = vld [vmem:[%s4527_s5] ss:$0 sm:$0xff] (!%p3071_p7) }
 0x170   : > { %v3254_v3 = vpop.f32.mrb[15].mxu1  ;;  %v3428_v59 = vpack.c.bf16 (!%p3071_p7), %v2697_v57, %v2696_v56 }
 0x171   : > { %v2391_v5 = vadd.f32 %v3252_v0, %v2351_v4 }
 0x172   : > { %3429 = vmatpush3.bf16.msra.mxu0 (!%p3071_p7), %v3428_v59 }
 0x18b   : > { %v3272_v42 = vpop.f32.mrb[16].mxu0 }
 0x18c   : > { %v3273_v7 = vpop.f32.mrb[17].mxu0 }
 0x18d   : > { %v3294_v6 = vpop.f32.mrb[16].mxu1  ;;  %v3274_v9 = vadd.f32 %v3273_v7, %v3272_v42  ;;  %v3275_v10 = vpop.f32.mrb[18].mxu0 }
 0x18e   : > { %v3295_v8 = vpop.f32.mrb[17].mxu1  ;;  %v3276_v13 = vpop.f32.mrb[19].mxu0 }
 0x18f   : > { %v3296_v11 = vadd.f32 %v3295_v8, %v3294_v6  ;;  %v3297_v12 = vpop.f32.mrb[18].mxu1  ;;  %v2431_v15 = vadd.f32 %v3274_v9, %v2391_v5 }
 0x190   : > { %v3298_v14 = vpop.f32.mrb[19].mxu1 }
 0x191   : > { %v2471_v16 = vadd.f32 %v3296_v11, %v2431_v15 }
 0x1ab   : > { %v3316_v17 = vpop.f32.mrb[20].mxu0 }
 0x1ac   : > { %v3317_v19 = vpop.f32.mrb[21].mxu0 }
 0x1ad   : > { %v3338_v18 = vpop.f32.mrb[20].mxu1  ;;  %v3318_v21 = vadd.f32 %v3317_v19, %v3316_v17  ;;  %v3319_v22 = vpop.f32.mrb[22].mxu0 }
 0x1ae   : > { %v3339_v20 = vpop.f32.mrb[21].mxu1  ;;  %v3320_v25 = vpop.f32.mrb[23].mxu0 }
 0x1af   : > { %v3340_v23 = vadd.f32 %v3339_v20, %v3338_v18  ;;  %v3341_v24 = vpop.f32.mrb[22].mxu1  ;;  %v2511_v27 = vadd.f32 %v3318_v21, %v2471_v16 }
 0x1b0   : > { %v3342_v26 = vpop.f32.mrb[23].mxu1 }
 0x1b1   : > { %v2551_v28 = vadd.f32 %v3340_v23, %v2511_v27 }
 0x1cb   : > { %v2590_v29 = vpop.f32.mrb[24].mxu0 }
 0x1cc   : > { %v2591_v30 = vadd.f32 %v2590_v29, %v2551_v28  ;;  %v3385_v31 = vpop.f32.mrb[25].mxu0 }
 0x1cd   : > { %v2593_v32 = vpop.f32.mrb[26].mxu0 }
 0x1ce   : > { %v2596_v33 = vmax.f32 %v2591_v30, 0.0  ;;  %v3386_v34 = vpop.f32.mrb[27].mxu0 }
 0x1d0   : > { %v2598_v35 = vpack.c.bf16 %v2596_v33, %v2596_v33 }
 0x1d2   : > { %3396 = vmatmul.mubr.msk.bf16.vlgmr.msra.gmra.mrb[24].mxu1 %vm2631_vm2, %v2598_v35 }
 0x2a2   : > { %2681 = sbr.rel (%p3071_p7) target bundleno = 907 (0x38b), region = 52 }
 0x2a5   : > { %v2669_v37 = vpop.f32.mrb[24].mxu1 }
 0x2a6   : > { %v2675_v38 = vadd.f32 %v2669_v37, %v2597_v36  ;;  %v3397_v39 = vpop.f32.mrb[25].mxu1 }
 0x2a7   : > { %v2672_v40 = vpop.f32.mrb[26].mxu1 }
 0x2a8   : > { %2677 = vst.msk [vmem:[#allocation2] sm:$0x3] %vm2676_vm3, %v2675_v38  ;;  %v3398_v41 = vpop.f32.mrb[27].mxu1 }
 0x2af   : > { %v2683_v55 = vld [vmem:[#allocation2] sm:$0x3] }
 0x2b0   : > { %v2688_v58 = vadd.f32 %v3072_v54, %v2683_v55 }
 0x2b2   : > { %v2689_v60 = vmax.f32 %v2688_v58, 0.0 }
 0x2b4   : > { %3416 = vmatmul.mubr.msk.f32.vlgmr.msra.gmra.mrb[0].mxu0 %vm2631_vm2, %v2689_v60 }
 0x387   : > { %v2774_v62 = vpop.f32.mrb[0].mxu0 }
 0x388   : > { %v2775_v63 = vadd.f32 %v3073_v61, %v2774_v62  ;;  %v3417_v0 = vpop.f32.mrb[1].mxu0 }
 0x38a   : > { %2778 = vst [vmem:[#allocation3] sm:$0x3] %v2775_v63 }
 0x38b PF: > { %p4487_p8 = scmp.eq.s32.totalorder %s2856_s24, 4  ;;  %s3739_s11 = smov [#allocation3]  }
 0x38c   : > { %s2788_s28 = sshll.u32 %s3739_s11, 4  ;;  %s2789_s28 = int_to_ptr.vmem [resolvable:$true] %s2788_s28 }
 0x38d   : > { %s3678_s29 = scalar_lea.vmem %s2789_s28, 32  ;;  %p3685_p12 = scmp.lt.s32.totalorder %s2789_s28, %s2789_s28 }
 0x38e   : > { %p3679_p9 = scmp.ne.s32.totalorder %s2789_s28, %s3678_s29  ;;  %p3686_p13 = scmp.lt.s32.totalorder %s3678_s29, %s3678_s29 }
 0x390   : > { %p3680_p10 = pnand %p3679_p9, %p4487_p8  ;;  %p3687_p0 = por %p3686_p13, %p3685_p12 }
 0x392   : > { %p3681_p11 = pneg %p3680_p10 }
 0x394   : > { %p3688_p1 = pnand %p3687_p0, %p3681_p11 }
 0x396   : > { %3691 = shalt.err (!%p3688_p1)
}
 0x397   : > { %s3692_s24 = scalar_lea.hbm %s4528_s6, 32 }
 0x398   : > { %p3693_p2 = scmp.ne.s32.totalorder %s4528_s6, %s3692_s24  ;;  %p3698_p5 = scmp.lt.u32.totalorder %s3692_s24, %s4528_s6 }
 0x39a   : > { %p3694_p3 = pnand %p3693_p2, %p4487_p8 }
 0x39c   : > { %p3695_p4 = pneg %p3694_p3 }
 0x39e   : > { %p3700_p6 = pnand %p3698_p5, %p3695_p4 }
 0x3a0   : > { %3703 = shalt.err (!%p3700_p6)
}
 0x3a1   : > { %3431 = dma.vmem_to_hbm [thread:$0]  (%p4487_p8), %s2789_s28, 32, %s4528_s6, [#allocation4]  }
 0x3a2   : > { %3717 = dma.done.wait (%p4487_p8), [#allocation4], 32  }
 0x3a3   : > { %3719 = vsyncadd (%p4487_p8), [#allocation4], 4294967264 }
 0x3a4 PF: > { %s17_s23 = sadd.s32 1, %s3730_s23   ;;  %s4530_s21 = smov %s3726_s22 }
 0x3a5   : > { %p14_p7 = scmp.ge.s32.totalorder %s17_s23, 7   ;;  %s4531_s22 = smov %s4533_s25 }
 0x3a7   :  { %16 = sbr.rel (!%p14_p7) target bundleno = 2 (0x2), region = 83 }
 0x3ae   :  { %2801 = vsyncpa [#allocation4], 1 }
 0x3af   :  { %2803 = vsyncpa [#allocation4 + $0x1], 1 }

</bundles_post_ra>
